<compile_context>
chip_gen: v5e
topology: v5e:2x2
jax: 0.10.0
libtpu: 0.0.40
codegen_flags: <defaults>
</compile_context>

<pallas_src>
import functools

import jax
import jax.numpy as jnp
from jax.experimental import pallas as pl
from jax.experimental.pallas import tpu as pltpu


def _softmax_blend_kernel(colors_ref, img_ref, *, K):
    # colors_ref: (4*K, TP)  channel-major RGBA texels, pixels on the lane axis;
    #             rows [c*K : (c+1)*K] are channel c across the K face layers.
    # img_ref:    (4, TP)    rows 0..2 = softmax-blended rgb, row 3 = ones.
    alpha = colors_ref[3 * K:4 * K, :].astype(jnp.float32)     # (K, TP)

    # softmax over K (sublane axis); everything stays lane-dense.
    m = jnp.max(alpha, axis=0, keepdims=True)                  # (1, TP)
    e = jnp.exp(alpha - m)                                     # (K, TP)  EUP
    denom = jnp.sum(e, axis=0, keepdims=True)                  # (1, TP)
    recip = pl.reciprocal(denom, approx=True)                  # one EUP recip / column

    # Weighted rgb reduction; normalize after the reduction (saves ~K VPU
    # multiplies per column).  Row-by-row stores, no concat / full-tile copy.
    for c in range(3):
        ch = colors_ref[c * K:(c + 1) * K, :].astype(jnp.float32)   # (K, TP)
        img_ref[c:c + 1, :] = (
            jnp.sum(ch * e, axis=0, keepdims=True) * recip
        ).astype(img_ref.dtype)
    img_ref[3:4, :] = jnp.ones((1, img_ref.shape[1]), dtype=img_ref.dtype)


def _pick_tile(P, K, itemsize, tile_p_hint):
    """Pick (tile_p, n_blocks): lane-aligned tile, >=4 even-count grid blocks."""
    tile_p = max(128, (int(tile_p_hint) // 128) * 128)
    # VMEM per lane: double-buffered input (4K rows) + double-buffered output
    # (4 rows, sublane-padded in VMEM) + headroom for the kernel's f32
    # intermediates (~4 K-row temporaries).
    out_rows_pad = 8 if itemsize >= 4 else 16
    bytes_per_lane = (2 * 4 * K * itemsize) + (2 * out_rows_pad * itemsize) + 4 * K * 4
    vmem_budget = 20 * 1024 * 1024        # under the 32 MiB limit set below
    max_tile = max(128, ((vmem_budget // bytes_per_lane) // 128) * 128)
    tile_p = min(tile_p, max_tile)
    # >=4 grid blocks when possible: both v7x TensorCores get >=2 pipelined
    # steps each, and v5e/v6e get prefetch overlap.
    while tile_p > 128 and pl.cdiv(P, tile_p) < 4:
        tile_p //= 2
    tile_p = max(128, (tile_p // 128) * 128)
    n_blocks = pl.cdiv(P, tile_p)
    # Even block count so the two v7x TensorCores get equal work; the extra
    # block (zero padding) only triggers for small P.
    if n_blocks > 1 and n_blocks % 2 == 1:
        n_blocks += 1
    return tile_p, n_blocks


def shade_channel_major(colors_cm, *, K, tile_p=32768):
    """PRIMARY API.

    colors_cm: (4*K, P) channel-major RGBA texels (row c*K + k = channel c of
    face layer k), pixels lane-dense.  Returns images_cm (4, P): rows 0..2 are
    the softmax-alpha-blended rgb, row 3 is ones.

    alpha needs no kernel work in this layout -- it is exactly the contiguous
    row-slice colors_cm[3*K:4*K, :] which the caller can take for free.
    """
    rows, P = colors_cm.shape
    assert rows == 4 * K, "expected channel-major (4*K, P) texels"
    dtype = colors_cm.dtype
    itemsize = jnp.dtype(dtype).itemsize

    tile_p, n_blocks = _pick_tile(P, K, itemsize, tile_p)
    P_pad = n_blocks * tile_p

    x = colors_cm
    if P_pad != P:
        # TODO(synk): producers that emit P as a multiple of the tile skip this pad copy.
        x = jnp.pad(x, ((0, 0), (0, P_pad - P)))

    cost = pl.CostEstimate(
        flops=(9 * K + 4) * P_pad,
        transcendentals=(K + 1) * P_pad,
        bytes_accessed=(4 * K + 4) * itemsize * P_pad,
    )

    images_cm = pl.pallas_call(
        functools.partial(_softmax_blend_kernel, K=K),
        out_shape=jax.ShapeDtypeStruct((4, P_pad), dtype),
        grid=(n_blocks,),
        in_specs=[pl.BlockSpec((4 * K, tile_p), lambda i: (0, i))],
        out_specs=pl.BlockSpec((4, tile_p), lambda i: (0, i)),
        compiler_params=pltpu.CompilerParams(
            dimension_semantics=("parallel",),
            # Explicit limit: above v5e's 16 MiB scoped default, well under
            # v7x's 64 MiB physical VMEM.
            vmem_limit_bytes=32 * 1024 * 1024,
        ),
        cost_estimate=cost,
    )(x)

    if P_pad != P:
        images_cm = images_cm[:, :P]
    return images_cm


def custom_flat_shader_forward(colors, *, tile_p=32768):
    """Compatibility wrapper matching the reference (N, H, W, K, 4) layout.

    NOTE: this path pays one HBM round-trip to transpose the texels to the
    lane-dense channel-major layout plus one for the output transpose.
    Producers/consumers that can work channel-major should call
    shade_channel_major() directly -- that transpose-free path is the real API.
    """
    N, H, W, K, C = colors.shape
    assert C == 4, "expected RGBA texels"
    P = N * H * W

    colors_cm = jnp.transpose(colors.reshape(P, K, C), (2, 1, 0)).reshape(4 * K, P)
    images_cm = shade_channel_major(colors_cm, K=K, tile_p=tile_p)

    images = jnp.transpose(images_cm, (1, 0)).reshape(N, H, W, 4)
    alpha = colors[..., 3]      # pure pass-through of the input; no kernel work
    return images, alpha


def _reference_forward(colors):
    rgb = colors[..., 0:3]
    alpha = colors[..., 3]
    blend = jax.nn.softmax(alpha, axis=-1)
    rgb = jnp.sum(rgb * blend[..., None], axis=3)
    a = jnp.ones(colors.shape[:3] + (1,), dtype=colors.dtype)
    return jnp.concatenate([rgb, a], axis=-1), alpha


if __name__ == "__main__":
    # Shapes consistent with the module: fragments.pix_to_face is (N, H, W, K);
    # sampled texels ("colors") are (N, H, W, K, 4).
    N, H, W, K = 2, 16, 16, 8
    key = jax.random.PRNGKey(0)
    k0, k1 = jax.random.split(key)
    colors = jax.random.normal(k0, (N, H, W, K, 4), dtype=jnp.float32)

    images, alpha = custom_flat_shader_forward(colors)
    images, alpha = jax.block_until_ready((images, alpha))

    ref_images, ref_alpha = _reference_forward(colors)
    assert images.shape == (N, H, W, 4)
    assert alpha.shape == (N, H, W, K)
    # approx EUP reciprocal has ~2^-12 relative error -> 2e-3 tolerance.
    assert jnp.allclose(images, ref_images, atol=2e-3, rtol=2e-3)
    assert jnp.array_equal(alpha, ref_alpha)

    # Exercise the primary channel-major API directly, including the ragged-P
    # (pixel count not a multiple of the tile) padding path.
    N2, H2, W2, K2 = 1, 7, 9, 8
    colors2 = jax.random.normal(k1, (N2, H2, W2, K2, 4), dtype=jnp.float32)
    P2 = N2 * H2 * W2
    colors2_cm = jnp.transpose(
        colors2.reshape(P2, K2, 4), (2, 1, 0)).reshape(4 * K2, P2)
    images2_cm = jax.block_until_ready(shade_channel_major(colors2_cm, K=K2))
    ref_images2, _ = _reference_forward(colors2)
    ref_images2_cm = jnp.transpose(ref_images2.reshape(P2, 4), (1, 0))
    assert images2_cm.shape == (4, P2)
    assert jnp.allclose(images2_cm, ref_images2_cm, atol=2e-3, rtol=2e-3)

    print("KERNEL_OK")
</pallas_src>

<mosaic_0001>
module attributes {stable_mosaic.version = 11 : i64} {
  func.func @_softmax_blend_kernel(%arg0: i32, %arg1: memref<32x128xf32, #tpu.memory_space<vmem>>, %arg2: memref<4x128xf32, #tpu.memory_space<vmem>>) attributes {dimension_semantics = [#tpu.dimension_semantics<parallel>], iteration_bounds = array<i64: 4>, scalar_prefetch = 0 : i64, scratch_operands = 0 : i64, tpu.core_type = #tpu.core_type<tc>, window_params = [{transform_indices = @transform_0, window_bounds = array<i64: 32, 128>}, {transform_indices = @transform_1, window_bounds = array<i64: 4, 128>}]} {
    %c24 = arith.constant 24 : index
    %c0 = arith.constant 0 : index
    %0 = vector.load %arg1[%c24, %c0] : memref<32x128xf32, #tpu.memory_space<vmem>>, vector<8x128xf32>
    %cst = arith.constant dense<0xFF800000> : vector<128xf32>
    %1 = vector.multi_reduction <maximumf>, %0, %cst [0] : vector<8x128xf32> to vector<128xf32>
    %2 = vector.shape_cast %1 : vector<128xf32> to vector<1x128xf32>
    %3 = vector.broadcast %2 : vector<1x128xf32> to vector<8x128xf32>
    %4 = arith.subf %0, %3 : vector<8x128xf32>
    %5 = math.exp %4 : vector<8x128xf32>
    %cst_0 = arith.constant dense<0.000000e+00> : vector<128xf32>
    %6 = vector.multi_reduction <add>, %5, %cst_0 [0] : vector<8x128xf32> to vector<128xf32>
    %7 = vector.shape_cast %6 : vector<128xf32> to vector<1x128xf32>
    %8 = tpu.reciprocal %7 {approx = true} : vector<1x128xf32> -> vector<1x128xf32>
    %c0_1 = arith.constant 0 : index
    %c0_2 = arith.constant 0 : index
    %9 = vector.load %arg1[%c0_1, %c0_2] : memref<32x128xf32, #tpu.memory_space<vmem>>, vector<8x128xf32>
    %10 = arith.mulf %9, %5 : vector<8x128xf32>
    %cst_3 = arith.constant dense<0.000000e+00> : vector<128xf32>
    %11 = vector.multi_reduction <add>, %10, %cst_3 [0] : vector<8x128xf32> to vector<128xf32>
    %12 = vector.shape_cast %11 : vector<128xf32> to vector<1x128xf32>
    %13 = arith.mulf %12, %8 : vector<1x128xf32>
    %c0_4 = arith.constant 0 : index
    %c0_5 = arith.constant 0 : index
    %14 = vector.load %arg2[%c0_4, %c0_5] : memref<4x128xf32, #tpu.memory_space<vmem>>, vector<1x128xf32>
    tpu.vector_store %arg2[%c0_4, %c0_5], %13 {strides = array<i32>} : memref<4x128xf32, #tpu.memory_space<vmem>>, vector<1x128xf32>,
    %c8 = arith.constant 8 : index
    %c0_6 = arith.constant 0 : index
    %15 = vector.load %arg1[%c8, %c0_6] : memref<32x128xf32, #tpu.memory_space<vmem>>, vector<8x128xf32>
    %16 = arith.mulf %15, %5 : vector<8x128xf32>
    %cst_7 = arith.constant dense<0.000000e+00> : vector<128xf32>
    %17 = vector.multi_reduction <add>, %16, %cst_7 [0] : vector<8x128xf32> to vector<128xf32>
    %18 = vector.shape_cast %17 : vector<128xf32> to vector<1x128xf32>
    %19 = arith.mulf %18, %8 : vector<1x128xf32>
    %c1 = arith.constant 1 : index
    %c0_8 = arith.constant 0 : index
    %20 = vector.load %arg2[%c1, %c0_8] : memref<4x128xf32, #tpu.memory_space<vmem>>, vector<1x128xf32>
    tpu.vector_store %arg2[%c1, %c0_8], %19 {strides = array<i32>} : memref<4x128xf32, #tpu.memory_space<vmem>>, vector<1x128xf32>,
    %c16 = arith.constant 16 : index
    %c0_9 = arith.constant 0 : index
    %21 = vector.load %arg1[%c16, %c0_9] : memref<32x128xf32, #tpu.memory_space<vmem>>, vector<8x128xf32>
    %22 = arith.mulf %21, %5 : vector<8x128xf32>
    %cst_10 = arith.constant dense<0.000000e+00> : vector<128xf32>
    %23 = vector.multi_reduction <add>, %22, %cst_10 [0] : vector<8x128xf32> to vector<128xf32>
    %24 = vector.shape_cast %23 : vector<128xf32> to vector<1x128xf32>
    %25 = arith.mulf %24, %8 : vector<1x128xf32>
    %c2 = arith.constant 2 : index
    %c0_11 = arith.constant 0 : index
    %26 = vector.load %arg2[%c2, %c0_11] : memref<4x128xf32, #tpu.memory_space<vmem>>, vector<1x128xf32>
    tpu.vector_store %arg2[%c2, %c0_11], %25 {strides = array<i32>} : memref<4x128xf32, #tpu.memory_space<vmem>>, vector<1x128xf32>,
    %cst_12 = arith.constant 1.000000e+00 : f32
    %27 = vector.broadcast %cst_12 : f32 to vector<1x128xf32>
    %c3 = arith.constant 3 : index
    %c0_13 = arith.constant 0 : index
    %28 = vector.load %arg2[%c3, %c0_13] : memref<4x128xf32, #tpu.memory_space<vmem>>, vector<1x128xf32>
    tpu.vector_store %arg2[%c3, %c0_13], %27 {strides = array<i32>} : memref<4x128xf32, #tpu.memory_space<vmem>>, vector<1x128xf32>,
    return
  }
  func.func @transform_0(%arg0: i32) -> (i32, i32) {
    %c0_i32 = arith.constant 0 : i32
    %c0_i32_0 = arith.constant 0 : i32
    return %c0_i32, %arg0 : i32, i32
  }
  func.func @transform_1(%arg0: i32) -> (i32, i32) {
    %c0_i32 = arith.constant 0 : i32
    %c0_i32_0 = arith.constant 0 : i32
    return %c0_i32, %arg0 : i32, i32
  }
}

</mosaic_0001>

<bundles_post_ra>
// kernel: tpu_custom_call.1
= control target key start
LH: loop header
LB: loop body
LE: loop exit
PB: predicated region body
PF: predicated region fallthrough
CT: control target
= control target key end

     0   :  { %6 = vsyncpa [#allocation3], 0  ;;  %s579_s0 = inlined_call_operand.hbm [shape: f32[32,512], index: 0, kind: input, shape index: {}]   ;;  %s580_s1 = inlined_call_operand.hbm [shape: f32[4,512], index: 1, kind: output, shape index: {}]  }
   0x1   :  { %8 = vsyncpa [#allocation3 + $0x1], 0 }
   0x2   :  { %9 = vsyncpa [#allocation4], 0 }
   0x3   :  { %11 = vsyncpa [#allocation4 + $0x1], 0  ;;  %s448_s6 = smov 0   ;;  %s450_s7 = smov 0  }
   0x4   :  { %s452_s8 = smov 0   ;;  %s454_s9 = smov 0  }
   0x5 LB: > { %s469_s10 = sadd.s32 4294967295, %s432_s9   ;;  %s270_s11 = sadd.s32 4294967294, %s432_s9   ;;  %s432_s9 = sphi %s454_s9, %s589_s9   ;;  %s428_s8 = sphi %s452_s8, %s588_s8   ;;  %s424_s7 = sphi %s450_s7, %s587_s7   ;;  %s420_s6 = sphi %s448_s6, %s586_s6  }
   0x6   : > { %s473_s12 = sadd.s32 1, %s432_s9   ;;  %s24_s13 = sadd.s32 1, %s428_s8 }
   0x7   : > { %s21_s14 = ssub.s32 %s432_s9, %s473_s12  ;;  %p31_p0 = scmp.ne.s32.totalorder %s428_s8, %s424_s7 }
   0x8   : > { %p22_p1 = scmp.eq.s32.totalorder %s21_s14, 0  ;;  %p32_p2 = scmp.eq.s32.totalorder %s432_s9, 0 }
   0x9   : > { %p37_p3 = scmp.ne.s32.totalorder %s424_s7, %s420_s6  ;;  %p38_p4 = scmp.eq.s32.totalorder %s469_s10, 0 }
   0xa   : > { %s485_s15 = scalar_select %p22_p1, %s428_s8, %s24_s13  }
   0xb   : > { %p487_p5 = por %p32_p2, %p31_p0  ;;  %p491_p6 = por %p38_p4, %p37_p3 }
   0xc   : > { %p61_p7 = scmp.eq.s32.totalorder %s469_s10, 3  ;;  %p67_p8 = scmp.eq.s32.totalorder %s270_s11, 3 }
   0xd   : > { %p294_p9 = scmp.lt.s32.totalorder %s432_s9, 4  ;;  %s87_s20 = sand.u32 1, %s428_s8  }
   0xe   : > { %p497_p10 = por %p61_p7, %p31_p0  ;;  %p501_p11 = por %p67_p8, %p37_p3 }
   0xf   : > { %s274_s21 = sshll.u32 %s432_s9, 3  ;;  %s273_s22 = sshll.u32 %s87_s20, 5 }
  0x10   : > { %s95_s25 = scalar_lea.hbm %s579_s0, %s274_s21  ;;  %s91_s27 = scalar_lea.vmem [#allocation2], %s273_s22 }
  0x11   : > { %s96_s26 = sshll.u32 %s95_s25, 4  ;;  %s98_s28 = sshll.u32 %s91_s27, 4  ;;  %s97_s26 = int_to_ptr.hbm [resolvable:$true] %s96_s26  ;;  %s99_s28 = int_to_ptr.vmem [resolvable:$true] %s98_s28 }
  0x12   : > { %p512_p12 = pnand %p294_p9, %p487_p5  ;;  %p275_p13 = scmp.ge.s32.totalorder %s432_s9, 1 }
  0x13   : > { %s88_s30 = scalar_lea.sflag [#allocation3], %s87_s20  ;;  %s336_s2 = sshra.s32 %s97_s26, 4  ;;  %s337_s2 = int_to_ptr.hbm [resolvable:$true] %s336_s2 }
  0x14   : > { %s338_s3 = scalar_lea.hbm %s337_s2, 32  ;;  %p340_p1 = pneg %p512_p12 }
  0x15   : > { %p339_p0 = scmp.ne.s32.totalorder %s337_s2, %s338_s3  ;;  %s343_s11 = scalar_lea.hbm %s579_s0, 128 }
  0x16   : > { %p344_p4 = scmp.lt.s32.totalorder %s337_s2, %s579_s0  ;;  %p345_p5 = scmp.lt.s32.totalorder %s343_s11, %s338_s3 }
  0x17   : > { %p341_p2 = pnand %p340_p1, %p339_p0 }
  0x18   : > { %p346_p7 = por %p345_p5, %p344_p4 }
  0x19   : > { %p342_p3 = pneg %p341_p2 }
  0x1b   : > { %p347_p8 = pnand %p346_p7, %p342_p3 }
  0x1d   : > { %350 = shalt.err (!%p347_p8)
}
  0x1e   : > { %s434_s16 = smov 512   ;;  %s435_s20 = smov 128  }
  0x1f   : > { %s436_s21 = smov 8   ;;  %p106_p9 = scmp.lt.s32.totalorder %s432_s9, 5 }
  0x20   : > { %289 = dma.hbm_to_vmem [thread:$0]  (!%p512_p12), %s97_s26, 512, %s99_s28, %s88_s30, %s434_s16, %s435_s20, %s436_s21  }
  0x21   : > { %p107_p0 = pnand %p275_p13, %p106_p9 }
  0x22   : > { %s531_s22 = sand.u32 (!%p107_p0), 1, %s424_s7  }
  0x23   : > { %110 = sbr.rel (%p107_p0) target bundleno = 91 (0x5b), region = 24  ;;  %s276_s23 = sshll.u32 (!%p107_p0), %s531_s22, 5 }
  0x24   : > { %s113_s24 = scalar_lea.sflag (!%p107_p0), [#allocation3], %s531_s22  ;;  %s116_s25 = scalar_lea.vmem (!%p107_p0), [#allocation2], %s276_s23 }
  0x28   : > { %411 = dma.done.wait (%p491_p6), %s113_s24, 512  }
  0x29   : > { %413 = vsyncadd (%p491_p6), %s113_s24, 4294966784  ;;  %v136_v0 = vld [vmem:[%s116_s25 + $0x18] sm:$0xff]  ;;  %s277_s26 = sshll.u32 %s531_s22, 2  ;;  %v437_v9 = vmov 1.0   ;;  %v153_v10 = vld [vmem:[%s116_s25] sm:$0xff]  ;;  %s279_s17 = sshll.u32 %s469_s10, 2 }
  0x2a   : > { %v137_v1 = vrot.slane %v136_v0, 4  ;;  %s540_s27 = scalar_lea.vmem [#allocation5], %s277_s26  ;;  %v163_v11 = vld [vmem:[%s116_s25 + $0x8] sm:$0xff]  ;;  %v173_v12 = vld [vmem:[%s116_s25 + $0x10] sm:$0xff]  ;;  %s195_s30 = scalar_lea.hbm %s580_s1, %s279_s17 }
  0x2b   : > { %183 = vst [vmem:[%s540_s27 + $0x3] sm:$0x1] %v437_v9  ;;  %s197_s2 = sshll.u32 %s540_s27, 4  ;;  %s199_s3 = sshll.u32 %s195_s30, 4  ;;  %s198_s2 = int_to_ptr.vmem [resolvable:$true] %s197_s2  ;;  %s200_s3 = int_to_ptr.hbm [resolvable:$true] %s199_s3 }
  0x2c   : > { %v138_v2 = vmax.f32 %v136_v0, %v137_v1  ;;  %s185_s10 = scalar_lea.sflag [#allocation4], %s531_s22  ;;  %s380_s4 = sshra.s32 %s200_s3, 4  ;;  %s381_s4 = int_to_ptr.hbm [resolvable:$true] %s380_s4 }
  0x2d   : > { %s382_s5 = scalar_lea.hbm %s381_s4, 4  ;;  %s386_s14 = scalar_lea.hbm %s580_s1, 16 }
  0x2e   : > { %v139_v3 = vrot.slane %v138_v2, 2  ;;  %p383_p6 = scmp.ne.s32.totalorder %s381_s4, %s382_s5  ;;  %p387_p1 = scmp.lt.s32.totalorder %s381_s4, %s580_s1 }
  0x2f   : > { %p388_p2 = scmp.lt.s32.totalorder %s386_s14, %s382_s5 }
  0x30   : > { %v140_v4 = vmax.f32 %v138_v2, %v139_v3  ;;  %p384_p12 = pnand %p383_p6, %p497_p10 }
  0x31   : > { %p389_p3 = por %p388_p2, %p387_p1 }
  0x32   : > { %v141_v5 = vrot.slane %v140_v4, 1  ;;  %p385_p13 = pneg %p384_p12 }
  0x34   : > { %v142_v6 = vmax.f32 %v140_v4, %v141_v5  ;;  %p390_p4 = pnand %p389_p3, %p385_p13 }
  0x36   : > { %v143_v7 = vsub.f32 %v136_v0, %v142_v6 }
  0x38   : > { %v144_v8 = vmul.f32 1.442695, %v143_v7 }
  0x3a   : > { %332 = vpow2.f32 %v144_v8 }
  0x40   : > { %v333_v13 = vpop.eup %332 }
  0x41   : > { %v146_v14 = vrot.slane %v333_v13, 4  ;;  %v154_v15 = vmul.f32 %v333_v13, %v153_v10  ;;  %v164_v16 = vmul.f32 %v333_v13, %v163_v11  ;;  %v174_v17 = vmul.f32 %v333_v13, %v173_v12 }
  0x43   : > { %v147_v18 = vadd.f32 %v333_v13, %v146_v14  ;;  %v155_v19 = vrot.slane %v154_v15, 4  ;;  %v165_v20 = vrot.slane %v164_v16, 4  ;;  %v175_v21 = vrot.slane %v174_v17, 4 }
  0x45   : > { %v148_v22 = vrot.slane %v147_v18, 2  ;;  %v156_v23 = vadd.f32 %v155_v19, %v154_v15  ;;  %v166_v24 = vadd.f32 %v165_v20, %v164_v16  ;;  %v176_v25 = vadd.f32 %v175_v21, %v174_v17 }
  0x47   : > { %v149_v26 = vadd.f32 %v148_v22, %v147_v18  ;;  %v157_v27 = vrot.slane %v156_v23, 2  ;;  %v167_v28 = vrot.slane %v166_v24, 2  ;;  %v177_v29 = vrot.slane %v176_v25, 2 }
  0x49   : > { %v150_v30 = vrot.slane %v149_v26, 1  ;;  %v158_v31 = vadd.f32 %v157_v27, %v156_v23  ;;  %v168_v32 = vadd.f32 %v167_v28, %v166_v24  ;;  %v178_v33 = vadd.f32 %v177_v29, %v176_v25 }
  0x4b   : > { %v151_v34 = vadd.f32 %v150_v30, %v149_v26  ;;  %v159_v35 = vrot.slane %v158_v31, 1  ;;  %v169_v36 = vrot.slane %v168_v32, 1  ;;  %v179_v37 = vrot.slane %v178_v33, 1 }
  0x4d   : > { %334 = vrcp.f32 %v151_v34  ;;  %v160_v38 = vadd.f32 %v159_v35, %v158_v31  ;;  %v170_v39 = vadd.f32 %v169_v36, %v168_v32  ;;  %v180_v40 = vadd.f32 %v179_v37, %v178_v33 }
  0x53   : > { %v335_v41 = vpop.eup %334 }
  0x54   : > { %v161_v42 = vmul.f32 %v335_v41, %v160_v38  ;;  %v171_v43 = vmul.f32 %v335_v41, %v170_v39  ;;  %v181_v44 = vmul.f32 %v335_v41, %v180_v40 }
  0x56   : > { %162 = vst [vmem:[%s540_s27] sm:$0x1] %v161_v42 }
  0x57   : > { %172 = vst [vmem:[%s540_s27 + $0x1] sm:$0x1] %v171_v43 }
  0x58   : > { %182 = vst [vmem:[%s540_s27 + $0x2] sm:$0x1] %v181_v44 }
  0x59   : > { %393 = shalt.err (!%p390_p4)
}
  0x5a   : > { %284 = dma.vmem_to_hbm [thread:$0]  (%p497_p10), %s198_s2, 64, %s200_s3, %s185_s10  }
  0x5b PF: > { %p295_p5 = scmp.ge.s32.totalorder %s432_s9, 2  ;;  %s211_s21 = sand.u32 1, %s420_s6  }
  0x5c   : > { %s212_s22 = scalar_lea.sflag [#allocation4], %s211_s21 }
  0x5d   : > { %p291_p7 = pnand %p295_p5, %p501_p11 }
  0x5f   : > { %p292_p8 = pneg %p291_p7 }
  0x61   : > { %415 = dma.done.wait (%p292_p8), %s212_s22, 64  }
  0x62   : > { %417 = vsyncadd (%p292_p8), %s212_s22, 4294967232  ;;  %p14_p9 = scmp.ge.s32.totalorder %s473_s12, 6   ;;  %s586_s6 = smov %s424_s7 }
  0x63   : > { %s587_s7 = smov %s428_s8  ;;  %s588_s8 = smov %s485_s15 }
  0x64   : > { %s589_s9 = smov %s473_s12  ;;  %16 = sbr.rel (!%p14_p9) target bundleno = 5 (0x5), region = 69 }
  0x69   :  { %218 = vsyncpa [#allocation3], 1 }
  0x6a   :  { %220 = vsyncpa [#allocation3 + $0x1], 1 }
  0x6b   :  { %221 = vsyncpa [#allocation4], 1 }
  0x6c   :  { %223 = vsyncpa [#allocation4 + $0x1], 1 }

</bundles_post_ra>
